<compile_context>
chip_gen: v7x
topology: tpu7x:2x2x1
jax: 0.10.0
libtpu: 0.0.40
codegen_flags: <defaults>
</compile_context>

<pallas_src>
import functools

import jax
import jax.numpy as jnp
from jax.experimental import pallas as pl
from jax.experimental.pallas import tpu as pltpu


def _round_up(a, m):
    return (a + m - 1) // m * m


def _log_sigmoid(x):
    # Numerically stable log(sigmoid(x)) = min(x, 0) - log1p(exp(-|x|))
    return jnp.minimum(x, 0.0) - jnp.log1p(jnp.exp(-jnp.abs(x)))


def mlp_kernel(x_ref, w1_ref, b1_ref, w2_ref, b2_ref, w3_ref, b3_ref, o_ref):
    # x_ref: [5, TM] bf16, w*: PyTorch [out, in] bf16, b*: [out, 1] f32.
    # bf16 operands go straight to the MXU; accumulation is f32.
    h1 = jnp.dot(w1_ref[...], x_ref[...],
                 preferred_element_type=jnp.float32) + b1_ref[...]   # [16, TM]
    h1 = _log_sigmoid(h1)

    h2 = jnp.dot(w2_ref[...], h1.astype(jnp.bfloat16),
                 preferred_element_type=jnp.float32) + b2_ref[...]   # [32, TM]
    h2 = jnp.maximum(h2, 0.0)

    out = jnp.dot(w3_ref[...], h2.astype(jnp.bfloat16),
                  preferred_element_type=jnp.float32) + b3_ref[...]  # [16, TM]
    o_ref[...] = out.astype(o_ref.dtype)                             # bf16 store


def _pick_tile(batch, block_cols):
    b_ceil = _round_up(max(batch, 1), 128)
    if block_cols is not None:
        return _round_up(min(block_cols, b_ceil), 128)
    tm = min(8192, b_ceil)
    # Guarantee >=2 grid steps whenever the batch spans more than one minimal
    # tile so the "parallel" grid axis can actually use both v7x TensorCores.
    if b_ceil > 128:
        tm = min(tm, _round_up(b_ceil // 2, 128))
    return tm


@functools.partial(jax.jit, static_argnames=("block_cols", "out_dtype"))
def neural_network_forward(x, params, block_cols=None, out_dtype=jnp.float32):
    w1, b1, w2, b2, w3, b3 = params            # PyTorch layout: w [out,in], b [out]
    B = x.shape[0]

    tm = _pick_tile(B, block_cols)
    grid_b = pl.cdiv(B, tm)
    b_pad = grid_b * tm

    # Lane-dense input: [5, B_pad] bf16.  Cast + transpose + (optional) pad fuse
    # into a single XLA fusion; pad rows are zero so downstream exp/log1p stay
    # finite before being sliced off.
    x_t = jnp.transpose(x).astype(jnp.bfloat16)
    if b_pad != B:
        x_t = jnp.pad(x_t, ((0, 0), (0, b_pad - B)))

    w1b, w2b, w3b = (w.astype(jnp.bfloat16) for w in (w1, w2, w3))
    b1c = b1.reshape(-1, 1).astype(jnp.float32)
    b2c = b2.reshape(-1, 1).astype(jnp.float32)
    b3c = b3.reshape(-1, 1).astype(jnp.float32)

    def resident(a):
        # Constant block index -> loaded once, stays VMEM-resident across steps.
        return pl.BlockSpec(a.shape, lambda i: (0, 0))

    out_t = pl.pallas_call(
        mlp_kernel,
        out_shape=jax.ShapeDtypeStruct((16, b_pad), jnp.bfloat16),
        grid=(grid_b,),
        in_specs=[
            pl.BlockSpec((5, tm), lambda i: (0, i)),   # x: tiled over batch lanes
            resident(w1b), resident(b1c),
            resident(w2b), resident(b2c),
            resident(w3b), resident(b3c),
        ],
        out_specs=pl.BlockSpec((16, tm), lambda i: (0, i)),
        compiler_params=pltpu.CompilerParams(
            dimension_semantics=("parallel",)),        # megacore over batch tiles
    )(x_t, w1b, b1c, w2b, b2c, w3b, b3c)

    # Restore [B, 16] row-major orientation for the caller (slice + transpose +
    # cast fuse into one XLA op).  Pass out_dtype=jnp.bfloat16 downstream to
    # avoid the final up-cast entirely.
    return jnp.transpose(out_t[:, :B]).astype(out_dtype)


def init_params(key):
    # Deterministic init mimicking nn.Linear default (uniform +/- 1/sqrt(fan_in)),
    # kept in PyTorch layout: weight [out_features, in_features], bias [out_features].
    def linear(key, fan_in, fan_out):
        kw, kb = jax.random.split(key)
        bound = 1.0 / jnp.sqrt(fan_in)
        w = jax.random.uniform(kw, (fan_out, fan_in), jnp.float32, -bound, bound)
        b = jax.random.uniform(kb, (fan_out,), jnp.float32, -bound, bound)
        return w, b

    k1, k2, k3 = jax.random.split(key, 3)
    w1, b1 = linear(k1, 5, 16)
    w2, b2 = linear(k2, 16, 32)
    w3, b3 = linear(k3, 32, 16)
    return w1, b1, w2, b2, w3, b3


def reference_forward(x, params):
    # Pure-JAX reference mirroring the kernel's rounding points (bf16 operands
    # into each matmul, f32 accumulation and activations, bf16 output store).
    w1, b1, w2, b2, w3, b3 = params
    rb = lambda a: a.astype(jnp.bfloat16).astype(jnp.float32)  # bf16 round-trip
    h1 = jax.nn.log_sigmoid(rb(x) @ rb(w1).T + b1)
    h2 = jax.nn.relu(rb(h1) @ rb(w2).T + b2)
    out = rb(h2) @ rb(w3).T + b3
    return rb(out)


if __name__ == "__main__":
    key = jax.random.PRNGKey(0)
    kx1, kx2, kp = jax.random.split(key, 3)
    params = init_params(kp)

    # Case 1: small ragged batch -> single 128-lane tile, exercises zero padding.
    B1 = 13
    x1 = jax.random.normal(kx1, (B1, 5), jnp.float32)
    out1 = jax.block_until_ready(neural_network_forward(x1, params))
    ref1 = reference_forward(x1, params)
    assert out1.shape == (B1, 16)
    assert jnp.allclose(out1, ref1, atol=2e-2, rtol=2e-2), "mismatch (case 1)"

    # Case 2: default tile selection -> 2 grid steps ("parallel" axis sharded).
    B2 = 300
    x2 = jax.random.normal(kx2, (B2, 5), jnp.float32)
    out2 = jax.block_until_ready(neural_network_forward(x2, params))
    ref2 = reference_forward(x2, params)
    assert out2.shape == (B2, 16)
    assert jnp.allclose(out2, ref2, atol=2e-2, rtol=2e-2), "mismatch (case 2)"

    # Case 3: forced small tile -> 3 grid steps + ragged tail, multi-step pipeline.
    out3 = jax.block_until_ready(
        neural_network_forward(x2, params, block_cols=128))
    assert out3.shape == (B2, 16)
    assert jnp.allclose(out3, ref2, atol=2e-2, rtol=2e-2), "mismatch (case 3)"

    print("KERNEL_OK")
</pallas_src>

<mosaic_0001>
module attributes {stable_mosaic.version = 11 : i64} {
  func.func @mlp_kernel(%arg0: i32, %arg1: memref<5x128xbf16, #tpu.memory_space<vmem>>, %arg2: memref<16x5xbf16, #tpu.memory_space<vmem>>, %arg3: memref<16x1xf32, #tpu.memory_space<vmem>>, %arg4: memref<32x16xbf16, #tpu.memory_space<vmem>>, %arg5: memref<32x1xf32, #tpu.memory_space<vmem>>, %arg6: memref<16x32xbf16, #tpu.memory_space<vmem>>, %arg7: memref<16x1xf32, #tpu.memory_space<vmem>>, %arg8: memref<16x128xbf16, #tpu.memory_space<vmem>>) attributes {dimension_semantics = [#tpu.dimension_semantics<parallel>], iteration_bounds = array<i64: 1>, scalar_prefetch = 0 : i64, scratch_operands = 0 : i64, tpu.core_type = #tpu.core_type<tc>, window_params = [{transform_indices = @transform_0, window_bounds = array<i64: 5, 128>}, {pipeline_mode = #tpu.pipeline_mode<synchronous>, transform_indices = @transform_1, window_bounds = array<i64: 16, 5>}, {pipeline_mode = #tpu.pipeline_mode<synchronous>, transform_indices = @transform_2, window_bounds = array<i64: 16, 1>}, {pipeline_mode = #tpu.pipeline_mode<synchronous>, transform_indices = @transform_3, window_bounds = array<i64: 32, 16>}, {pipeline_mode = #tpu.pipeline_mode<synchronous>, transform_indices = @transform_4, window_bounds = array<i64: 32, 1>}, {pipeline_mode = #tpu.pipeline_mode<synchronous>, transform_indices = @transform_5, window_bounds = array<i64: 16, 32>}, {pipeline_mode = #tpu.pipeline_mode<synchronous>, transform_indices = @transform_6, window_bounds = array<i64: 16, 1>}, {transform_indices = @transform_7, window_bounds = array<i64: 16, 128>}]} {
    %c0 = arith.constant 0 : index
    %c0_0 = arith.constant 0 : index
    %0 = vector.load %arg2[%c0, %c0_0] : memref<16x5xbf16, #tpu.memory_space<vmem>>, vector<16x5xbf16>
    %c0_1 = arith.constant 0 : index
    %c0_2 = arith.constant 0 : index
    %1 = vector.load %arg1[%c0_1, %c0_2] : memref<5x128xbf16, #tpu.memory_space<vmem>>, vector<5x128xbf16>
    %cst = arith.constant dense<0.000000e+00> : vector<16x128xf32>
    %2 = tpu.matmul %0, %1, %cst {dimension_numbers = #tpu.dot_dimension_numbers<[1], [0], [0], [1], [0, 0, 1, 1], [], []>} : vector<16x5xbf16>, vector<5x128xbf16>, vector<16x128xf32> -> vector<16x128xf32>
    %c0_3 = arith.constant 0 : index
    %c0_4 = arith.constant 0 : index
    %3 = vector.load %arg3[%c0_3, %c0_4] : memref<16x1xf32, #tpu.memory_space<vmem>>, vector<16x1xf32>
    %4 = vector.broadcast %3 : vector<16x1xf32> to vector<16x128xf32>
    %5 = arith.addf %2, %4 : vector<16x128xf32>
    %cst_5 = arith.constant 0.000000e+00 : f32
    %6 = vector.broadcast %cst_5 : f32 to vector<16x128xf32>
    %7 = arith.minimumf %5, %6 : vector<16x128xf32>
    %8 = math.absf %5 : vector<16x128xf32>
    %cst_6 = arith.constant 0.000000e+00 : f32
    %9 = vector.broadcast %cst_6 : f32 to vector<16x128xf32>
    %10 = arith.subf %9, %8 : vector<16x128xf32>
    %11 = math.exp %10 : vector<16x128xf32>
    %12 = math.log1p %11 : vector<16x128xf32>
    %13 = arith.subf %7, %12 : vector<16x128xf32>
    %c0_7 = arith.constant 0 : index
    %c0_8 = arith.constant 0 : index
    %14 = vector.load %arg4[%c0_7, %c0_8] : memref<32x16xbf16, #tpu.memory_space<vmem>>, vector<32x16xbf16>
    %15 = arith.truncf %13 : vector<16x128xf32> to vector<16x128xbf16>
    %cst_9 = arith.constant dense<0.000000e+00> : vector<32x128xf32>
    %16 = tpu.matmul %14, %15, %cst_9 {dimension_numbers = #tpu.dot_dimension_numbers<[1], [0], [0], [1], [0, 0, 1, 1], [], []>} : vector<32x16xbf16>, vector<16x128xbf16>, vector<32x128xf32> -> vector<32x128xf32>
    %c0_10 = arith.constant 0 : index
    %c0_11 = arith.constant 0 : index
    %17 = vector.load %arg5[%c0_10, %c0_11] : memref<32x1xf32, #tpu.memory_space<vmem>>, vector<32x1xf32>
    %18 = vector.broadcast %17 : vector<32x1xf32> to vector<32x128xf32>
    %19 = arith.addf %16, %18 : vector<32x128xf32>
    %cst_12 = arith.constant 0.000000e+00 : f32
    %20 = vector.broadcast %cst_12 : f32 to vector<32x128xf32>
    %21 = arith.maximumf %19, %20 : vector<32x128xf32>
    %c0_13 = arith.constant 0 : index
    %c0_14 = arith.constant 0 : index
    %22 = vector.load %arg6[%c0_13, %c0_14] : memref<16x32xbf16, #tpu.memory_space<vmem>>, vector<16x32xbf16>
    %23 = arith.truncf %21 : vector<32x128xf32> to vector<32x128xbf16>
    %cst_15 = arith.constant dense<0.000000e+00> : vector<16x128xf32>
    %24 = tpu.matmul %22, %23, %cst_15 {dimension_numbers = #tpu.dot_dimension_numbers<[1], [0], [0], [1], [0, 0, 1, 1], [], []>} : vector<16x32xbf16>, vector<32x128xbf16>, vector<16x128xf32> -> vector<16x128xf32>
    %c0_16 = arith.constant 0 : index
    %c0_17 = arith.constant 0 : index
    %25 = vector.load %arg7[%c0_16, %c0_17] : memref<16x1xf32, #tpu.memory_space<vmem>>, vector<16x1xf32>
    %26 = vector.broadcast %25 : vector<16x1xf32> to vector<16x128xf32>
    %27 = arith.addf %24, %26 : vector<16x128xf32>
    %28 = arith.truncf %27 : vector<16x128xf32> to vector<16x128xbf16>
    %c0_18 = arith.constant 0 : index
    %c0_19 = arith.constant 0 : index
    %29 = vector.load %arg8[%c0_18, %c0_19] : memref<16x128xbf16, #tpu.memory_space<vmem>>, vector<16x128xbf16>
    tpu.vector_store %arg8[%c0_18, %c0_19], %28 {strides = array<i32>} : memref<16x128xbf16, #tpu.memory_space<vmem>>, vector<16x128xbf16>,
    return
  }
  func.func @transform_0(%arg0: i32) -> (i32, i32) {
    %c0_i32 = arith.constant 0 : i32
    %c0_i32_0 = arith.constant 0 : i32
    return %c0_i32, %arg0 : i32, i32
  }
  func.func @transform_1(%arg0: i32) -> (i32, i32) {
    %c0_i32 = arith.constant 0 : i32
    %c0_i32_0 = arith.constant 0 : i32
    %c0_i32_1 = arith.constant 0 : i32
    return %c0_i32, %c0_i32_0 : i32, i32
  }
  func.func @transform_2(%arg0: i32) -> (i32, i32) {
    %c0_i32 = arith.constant 0 : i32
    %c0_i32_0 = arith.constant 0 : i32
    %c0_i32_1 = arith.constant 0 : i32
    return %c0_i32, %c0_i32_0 : i32, i32
  }
  func.func @transform_3(%arg0: i32) -> (i32, i32) {
    %c0_i32 = arith.constant 0 : i32
    %c0_i32_0 = arith.constant 0 : i32
    %c0_i32_1 = arith.constant 0 : i32
    return %c0_i32, %c0_i32_0 : i32, i32
  }
  func.func @transform_4(%arg0: i32) -> (i32, i32) {
    %c0_i32 = arith.constant 0 : i32
    %c0_i32_0 = arith.constant 0 : i32
    %c0_i32_1 = arith.constant 0 : i32
    return %c0_i32, %c0_i32_0 : i32, i32
  }
  func.func @transform_5(%arg0: i32) -> (i32, i32) {
    %c0_i32 = arith.constant 0 : i32
    %c0_i32_0 = arith.constant 0 : i32
    %c0_i32_1 = arith.constant 0 : i32
    return %c0_i32, %c0_i32_0 : i32, i32
  }
  func.func @transform_6(%arg0: i32) -> (i32, i32) {
    %c0_i32 = arith.constant 0 : i32
    %c0_i32_0 = arith.constant 0 : i32
    %c0_i32_1 = arith.constant 0 : i32
    return %c0_i32, %c0_i32_0 : i32, i32
  }
  func.func @transform_7(%arg0: i32) -> (i32, i32) {
    %c0_i32 = arith.constant 0 : i32
    %c0_i32_0 = arith.constant 0 : i32
    return %c0_i32, %arg0 : i32, i32
  }
}

</mosaic_0001>

<bundles_post_ra>
// kernel: neural_network_forward.1
= control target key start
LH: loop header
LB: loop body
LE: loop exit
PB: predicated region body
PF: predicated region fallthrough
CT: control target
= control target key end

     0   :  { %vm51_vm0 = vcmask 1041408   ;;  %vm52_vm1 = vcmask 1042432   ;;  %v371_v0 = vmov 0.0   ;;  %v372_v2 = vmov 65535   ;;  %s466_s0 = inlined_call_operand.vmem [shape: bf16[5,128], index: 0, kind: input, shape index: {}]   ;;  %s467_s1 = inlined_call_operand.vmem [shape: bf16[16,5], index: 1, kind: input, shape index: {}]   ;;  %s468_s2 = inlined_call_operand.vmem [shape: f32[16,1], index: 2, kind: input, shape index: {}]   ;;  %s469_s4 = inlined_call_operand.vmem [shape: f32[32,1], index: 4, kind: input, shape index: {}]   ;;  %s470_s6 = inlined_call_operand.vmem [shape: f32[16,1], index: 6, kind: input, shape index: {}]   ;;  %s471_s3 = inlined_call_operand.vmem [shape: bf16[32,16], index: 3, kind: input, shape index: {}]   ;;  %s472_s5 = inlined_call_operand.vmem [shape: bf16[16,32], index: 5, kind: input, shape index: {}]   ;;  %s473_s7 = inlined_call_operand.vmem [shape: bf16[16,128], index: 7, kind: output, shape index: {}]  }
   0x1   :  { %333 = vmatprep.subr.bf16.mxu0 %v371_v0  ;;  %v29_v1 = vld [vmem:[%s466_s0] sm:$0x7]  ;;  %v53_v3 = vsel %vm51_vm0, 4294967295, %v372_v2  ;;  %vm373_vm2 = vmmov 0   ;;  %v374_v6 = vmov 0   ;;  %vm47_vm3 = vcmask 39936  }
   0x2   :  { %v54_v4 = vsel %vm52_vm1, %v53_v3, 0  ;;  %335 = vmatprep.mubr.msk.bf16.mxu0 %vm373_vm2, %v371_v0  ;;  %357 = vset.pattern.permute.xlu0 %v374_v6  ;;  %v30_v7 = vld [vmem:[%s468_s2] sm:$0xff]  ;;  %v31_v9 = vld [vmem:[%s468_s2 + $0x8] sm:$0xff]  ;;  %v136_v10 = vld [vmem:[%s469_s4 + $0x10] sm:$0xff]  ;;  %vm168_vm4 = vcmask 130048   ;;  %vm249_vm7 = vcmask 261120  }
   0x3   :  { %v56_v5 = vand.u32 %v54_v4, %v29_v1  ;;  %358 = vset.pattern.permute.xlu1 %v374_v6  ;;  %v359_v8 = vld [vmem:[%s467_s1] sm:$0xff]   ;;  %34 = vperm.xlu0 %357, %v30_v7   ;;  %v135_v14 = vld [vmem:[%s469_s4 + $0x8] sm:$0xff]  ;;  %v137_v15 = vld [vmem:[%s469_s4 + $0x18] sm:$0xff] }
   0x4   :  { %v232_v11 = vld [vmem:[%s470_s6] sm:$0xff]  ;;  %v233_v16 = vld [vmem:[%s470_s6 + $0x8] sm:$0xff] }
   0x5   :  { %334 = vmatpush3.bf16.msra.mxu0 %v56_v5  ;;  %v360_v12 = vld [vmem:[%s471_s3] sm:$0xff]   ;;  %v361_v54 = vld [vmem:[%s471_s3 + $0x8] sm:$0xff]  }
   0x6   :  { %345 = vmatprep.subr.bf16.mxu0 %v371_v0  ;;  %341 = vmatprep.mubr.msk.bf16.mxu1 %vm168_vm4, %v360_v12  ;;  %v134_v13 = vld [vmem:[%s469_s4] sm:$0xff] }
   0x7   :  { %39 = vperm.xlu0 %357, %v31_v9   ;;  %140 = vperm.xlu1 %358, %v134_v13  }
   0x8   :  { %336 = vmatmul.mubr.msk.bf16.vlgmr.msra.gmra.mrb[0].mxu0 %vm47_vm3, %v359_v8 }
   0x9   :  { %349 = vmatprep.mubr.msk.bf16.mxu0 %vm373_vm2, %v371_v0 }
   0xb   :  { %150 = vperm.xlu0 %357, %v136_v10   ;;  %145 = vperm.xlu1 %358, %v135_v14   ;;  %v362_v10 = vld [vmem:[%s472_s5] sm:$0xff]  }
   0xf   :  { %236 = vperm.xlu0 %357, %v232_v11   ;;  %155 = vperm.xlu1 %358, %v137_v15  }
  0x13   :  { %241 = vperm.xlu1 %358, %v233_v16  }
  0x82   :  { %v35_v17 = vpop.permute.xlu0 %34 }
  0x86   :  { %v40_v21 = vpop.permute.xlu0 %39  ;;  %v141_v55 = vpop.permute.xlu1 %140 }
  0x8a   :  { %v146_v56 = vpop.permute.xlu1 %145  ;;  %v151_v57 = vpop.permute.xlu0 %150 }
  0x8e   :  { %v156_v61 = vpop.permute.xlu1 %155  ;;  %v237_v12 = vpop.permute.xlu0 %236 }
  0x92   :  { %v242_v14 = vpop.permute.xlu1 %241 }
  0xdb   :  { %v92_v18 = vpop.f32.mrb[0].mxu0 }
  0xdc   :  { %v93_v19 = vadd.f32 %v92_v18, %v35_v17  ;;  %v337_v20 = vpop.f32.mrb[1].mxu0 }
  0xdd   :  { %v95_v22 = vpop.f32.mrb[2].mxu0 }
  0xde   :  { %v101_v23 = vand.u32 2147483647, %v93_v19  ;;  %v96_v24 = vadd.f32 %v95_v22, %v40_v21  ;;  %v338_v25 = vpop.f32.mrb[3].mxu0  ;;  %v99_v48 = vmin.f32 %v93_v19, 0.0 }
  0xe0   :  { %v103_v26 = vsub.f32 0.0, %v101_v23  ;;  %v102_v27 = vand.u32 2147483647, %v96_v24  ;;  %v100_v49 = vmin.f32 %v96_v24, 0.0 }
  0xe2   :  { %v105_v28 = vmul.f32 1.442695, %v103_v26  ;;  %v104_v29 = vsub.f32 0.0, %v102_v27 }
  0xe4   :  { %363 = vpow2.f32 %v105_v28  ;;  %v107_v30 = vmul.f32 1.442695, %v104_v29 }
  0xe6   :  { %365 = vpow2.f32 %v107_v30 }
  0xee   :  { %v364_v31 = vpop.eup %363 }
  0xef   :  { %v109_v32 = vadd.f32 1.0, %v364_v31  ;;  %v112_v35 = vmul.f32 -0.5, %v364_v31  ;;  %v115_v38 = vand.u32 2147483647, %v364_v31 }
  0xf0   :  { %v366_v33 = vpop.eup %365 }
  0xf1   :  { %367 = vlog2.f32 %v109_v32  ;;  %v118_v34 = vadd.f32 1.0, %v366_v33  ;;  %v121_v36 = vmul.f32 -0.5, %v366_v33  ;;  %v113_v37 = vadd.f32 1.0, %v112_v35 }
  0xf2   :  { %v124_v41 = vand.u32 2147483647, %v366_v33  ;;  %vm116_vm5 = vcmp.lt.f32.partialorder %v115_v38, 0.0004427343 }
  0xf3   :  { %369 = vlog2.f32 %v118_v34  ;;  %v122_v39 = vadd.f32 1.0, %v121_v36  ;;  %v114_v43 = vmul.f32 %v364_v31, %v113_v37 }
  0xf4   :  { %vm125_vm6 = vcmp.lt.f32.partialorder %v124_v41, 0.0004427343 }
  0xf5   :  { %v123_v47 = vmul.f32 %v366_v33, %v122_v39 }
  0xfb   :  { %v368_v40 = vpop.eup %367 }
  0xfc   :  { %v111_v42 = vmul.f32 0.6931472, %v368_v40 }
  0xfd   :  { %v370_v44 = vpop.eup %369 }
  0xfe   :  { %v117_v45 = vsel %vm116_vm5, %v114_v43, %v111_v42  ;;  %v120_v46 = vmul.f32 0.6931472, %v370_v44 }
  0xff   :  { %v127_v51 = vsub.f32 %v99_v48, %v117_v45 }
 0x100   :  { %v126_v50 = vsel %vm125_vm6, %v123_v47, %v120_v46 }
 0x101   :  { %v128_v52 = vsub.f32 %v100_v49, %v126_v50 }
 0x103   :  { %v133_v53 = vpack.c.bf16 %v128_v52, %v127_v51 }
 0x105   :  { %339 = vmatprep.subr.bf16.mxu1 %v133_v53 }
 0x106   :  { %340 = vmatpush3.bf16.msra.mxu1 %v133_v53 }
 0x109   :  { %342 = vmatmul.mubr.msk.bf16.vlgmr.msra.gmra.mrb[0].mxu1 %vm168_vm4, %v361_v54 }
 0x1dc   :  { %v343_v58 = vpop.f32.mrb[0].mxu1 }
 0x1dd   :  { %v218_v59 = vadd.f32 %v343_v58, %v151_v57  ;;  %v209_v60 = vpop.f32.mrb[1].mxu1 }
 0x1de   :  { %v210_v62 = vadd.f32 %v209_v60, %v141_v55  ;;  %v344_v63 = vpop.f32.mrb[2].mxu1 }
 0x1df   :  { %v221_v1 = vadd.f32 %v344_v63, %v156_v61  ;;  %v212_v2 = vpop.f32.mrb[3].mxu1  ;;  %v226_v4 = vmax.f32 %v218_v59, 0.0 }
 0x1e0   :  { %v213_v3 = vadd.f32 %v212_v2, %v146_v56  ;;  %v224_v6 = vmax.f32 %v210_v62, 0.0 }
 0x1e1   :  { %v227_v5 = vmax.f32 %v221_v1, 0.0 }
 0x1e2   :  { %v225_v7 = vmax.f32 %v213_v3, 0.0 }
 0x1e3   :  { %v231_v8 = vpack.c.bf16 %v227_v5, %v226_v4 }
 0x1e4   :  { %v230_v9 = vpack.c.bf16 %v225_v7, %v224_v6 }
 0x1e6   :  { %346 = vmatpush3.bf16.msra.mxu0 %v230_v9 }
 0x1e7   :  { %347 = vmatprep.subr.bf16.mxu0 %v371_v0 }
 0x1ea   :  { %348 = vmatpush3.bf16.msra.mxu0 %v231_v8 }
 0x1ed   :  { %350 = vmatmul.mubr.msk.bf16.vlgmr.msra.gmra.mrb[4].mxu0 %vm249_vm7, %v362_v10 }
 0x2c0   :  { %v287_v11 = vpop.f32.mrb[4].mxu0 }
 0x2c1   :  { %v351_v13 = vpop.f32.mrb[5].mxu0  ;;  %v288_v16 = vadd.f32 %v287_v11, %v237_v12 }
 0x2c2   :  { %v290_v15 = vpop.f32.mrb[6].mxu0 }
 0x2c3   :  { %v291_v17 = vadd.f32 %v290_v15, %v242_v14  ;;  %v352_v18 = vpop.f32.mrb[7].mxu0 }
 0x2c5   :  { %v323_v19 = vpack.c.bf16 %v291_v17, %v288_v16 }
 0x2c7   :  { %324 = vst [vmem:[%s473_s7] sm:$0xff] %v323_v19  }

</bundles_post_ra>
